<compile_context>
chip_gen: v7x
topology: tpu7x:2x2x1
jax: 0.10.0
libtpu: 0.0.40
codegen_flags: <defaults>
</compile_context>

<pallas_src>
import functools

import jax
import jax.numpy as jnp
from jax.experimental import pallas as pl
from jax.experimental.pallas import tpu as pltpu


def _round_up(x, m):
    return ((x + m - 1) // m) * m


def _actor_kernel(n_layers, *refs):
    """Fused MLP forward on one batch tile:
       (linear + relu) * (L-1) -> linear -> softmax(axis=-1).

    refs = (x_ref, w0, b0, w1, b1, ..., w_{L-1}, b_{L-1}, out_ref)
      x_ref  : (TB, s_size) f32 batch tile
      w_i    : (in_i, out_i) bf16, VMEM-resident (constant index_map)
      b_i    : (1, out_i)   f32,  VMEM-resident
      out_ref: (TB, a_size) f32 probabilities
    """
    x_ref = refs[0]
    out_ref = refs[-1]
    wb_refs = refs[1:-1]

    h = x_ref[...].astype(jnp.float32)
    for li in range(n_layers):
        w = wb_refs[2 * li][...]            # (in, out) bf16
        b = wb_refs[2 * li + 1][...]        # (1, out)  f32
        # bf16 operands on the MXU, f32 accumulation; bias/ReLU stay f32.
        z = jnp.dot(h.astype(jnp.bfloat16), w,
                    preferred_element_type=jnp.float32) + b
        h = jnp.maximum(z, 0.0) if li < n_layers - 1 else z

    # softmax over dim=1 (action axis): max-subtracted, exact f32 normalization
    # so each row sums to 1 (log-prob / sampling safe).
    m = jnp.max(h, axis=-1, keepdims=True)
    e = jnp.exp(h - m)
    out_ref[...] = (e / jnp.sum(e, axis=-1, keepdims=True)).astype(out_ref.dtype)


def _choose_batch_tile(B, block_b):
    """Batch tile: big enough to amortize per-grid-step overhead (~0.35 us),
    at least 2 blocks when splittable (both v7x TensorCores get work on the
    'parallel' axis), and adaptive so the last block is mostly real rows."""
    rows = _round_up(max(B, 1), 8)
    if rows <= 8:
        return 8                                    # too small to split
    n_blocks = max(2, pl.cdiv(B, block_b))
    return _round_up(pl.cdiv(B, n_blocks), 8)


def _resident_spec(shape):
    """Full-array block with a constant index_map -> stays in VMEM across the
    whole grid.  Single-buffered: it never changes, so no 2nd pipeline buffer."""
    try:
        return pl.BlockSpec(shape, lambda i: (0, 0),
                            pipeline_mode=pl.Buffered(1))
    except (TypeError, ValueError):                 # older Pallas: no pipeline_mode
        return pl.BlockSpec(shape, lambda i: (0, 0))


def actor_forward(x, weights, biases, *, block_b=1024):
    """x: (B, s_size) f32; weights[i]: (in_i, out_i); biases[i]: (1, out_i).

    Returns softmax probabilities of shape (B, a_size), matching
    softmax(layers[-1](relu(...)), dim=1) of the PyTorch Actor.
    """
    assert len(weights) == len(biases) and len(weights) >= 1
    n_layers = len(weights)
    B, s_size = x.shape
    a_size = weights[-1].shape[1]

    # bf16 weights for the MXU (halves weight DMA / VMEM); biases stay f32.
    weights = [w.astype(jnp.bfloat16) for w in weights]
    biases = [b.astype(jnp.float32) for b in biases]

    # ---- adaptive batch tiling -------------------------------------------
    tb = _choose_batch_tile(B, block_b)
    b_padded = _round_up(B, tb)
    if b_padded != B:
        # zero rows -> bias-only logits -> finite softmax; trimmed after the call.
        x = jnp.pad(x, ((0, b_padded - B), (0, 0)))
    num_blocks = b_padded // tb

    operands = [x]
    for w, b in zip(weights, biases):
        operands.append(w)
        operands.append(b)

    in_specs = [pl.BlockSpec((tb, s_size), lambda i: (i, 0))]
    for w, b in zip(weights, biases):
        in_specs.append(_resident_spec(w.shape))
        in_specs.append(_resident_spec(b.shape))

    # Advisory cost model for XLA's scheduler (kernel is launch/HBM bound).
    layer_dims = [(w.shape[0], w.shape[1]) for w in weights]
    flops = 2 * b_padded * sum(din * dout for din, dout in layer_dims)
    transcendentals = b_padded * a_size                       # exp in softmax
    bytes_accessed = (x.size * x.dtype.itemsize
                      + sum(w.size * w.dtype.itemsize for w in weights)
                      + sum(b.size * b.dtype.itemsize for b in biases)
                      + b_padded * a_size * 4)

    out = pl.pallas_call(
        functools.partial(_actor_kernel, n_layers),
        out_shape=jax.ShapeDtypeStruct((b_padded, a_size), jnp.float32),
        grid=(num_blocks,),
        in_specs=in_specs,
        # Real-width output block (a_size = full array dim): masked vst in the
        # store slot, but 32x less HBM writeback than the old 128-lane padding.
        out_specs=pl.BlockSpec((tb, a_size), lambda i: (i, 0)),
        compiler_params=pltpu.CompilerParams(
            dimension_semantics=("parallel",)),      # shard blocks across v7x TCs
        cost_estimate=pl.CostEstimate(
            flops=flops,
            transcendentals=transcendentals,
            bytes_accessed=bytes_accessed),
    )(*operands)

    # Only padded rows need trimming (a tiny (B, a_size) copy); skip if aligned.
    return out if b_padded == B else out[:B]


def init_actor_params(key, s_size, a_size, h_sizes):
    """Deterministic init mimicking nn.Linear's U(-1/sqrt(fan_in), 1/sqrt(fan_in)).
    Weights are stored transposed relative to torch (shape (in, out))."""
    dims_in = [s_size] + h_sizes
    dims_out = h_sizes + [a_size]
    weights, biases = [], []
    for din, dout in zip(dims_in, dims_out):
        key, kw, kb = jax.random.split(key, 3)
        bound = 1.0 / jnp.sqrt(jnp.float32(din))
        weights.append(jax.random.uniform(kw, (din, dout), jnp.float32, -bound, bound))
        biases.append(jax.random.uniform(kb, (1, dout), jnp.float32, -bound, bound))
    return weights, biases


def actor_forward_ref(x, weights, biases):
    """Plain-JAX reference emulating the kernel's bf16-matmul / f32-everything-else
    math for a tight correctness comparison."""
    h = x.astype(jnp.float32)
    for i, (w, b) in enumerate(zip(weights, biases)):
        h = jnp.dot(h.astype(jnp.bfloat16), w.astype(jnp.bfloat16),
                    preferred_element_type=jnp.float32) + b.astype(jnp.float32)
        if i < len(weights) - 1:
            h = jnp.maximum(h, 0.0)
    return jax.nn.softmax(h, axis=1)


if __name__ == "__main__":
    key = jax.random.PRNGKey(0)

    # Shapes consistent with the module: Actor(s_size=16, a_size=4, h_sizes=[32, 32])
    s_size, a_size, h_sizes = 16, 4, [32, 32]

    key, kp = jax.random.split(key)
    weights, biases = init_actor_params(kp, s_size, a_size, h_sizes)

    # batch=2: single-block path; batch=300: multi-block grid + row-padding trim.
    for batch in (2, 300):
        key, kx = jax.random.split(key)
        x = jax.random.normal(kx, (batch, s_size), jnp.float32)

        out = jax.block_until_ready(actor_forward(x, weights, biases))
        ref = actor_forward_ref(x, weights, biases)

        assert out.shape == (batch, a_size)
        # exact f32 normalization -> rows sum to 1 up to rounding
        assert jnp.allclose(jnp.sum(out, axis=1), 1.0, atol=1e-5)
        assert jnp.allclose(out, ref, atol=2e-3, rtol=2e-3)

    print("KERNEL_OK")
</pallas_src>

<mosaic_0001>
module attributes {stable_mosaic.version = 11 : i64} {
  func.func @_actor_kernel(%arg0: i32, %arg1: memref<8x16xf32, #tpu.memory_space<vmem>>, %arg2: memref<16x32xbf16, #tpu.memory_space<vmem>>, %arg3: memref<1x32xf32, #tpu.memory_space<vmem>>, %arg4: memref<32x32xbf16, #tpu.memory_space<vmem>>, %arg5: memref<1x32xf32, #tpu.memory_space<vmem>>, %arg6: memref<32x4xbf16, #tpu.memory_space<vmem>>, %arg7: memref<1x4xf32, #tpu.memory_space<vmem>>, %arg8: memref<8x4xf32, #tpu.memory_space<vmem>>) attributes {dimension_semantics = [#tpu.dimension_semantics<parallel>], iteration_bounds = array<i64: 1>, scalar_prefetch = 0 : i64, scratch_operands = 0 : i64, tpu.core_type = #tpu.core_type<tc>, window_params = [{transform_indices = @transform_0, window_bounds = array<i64: 8, 16>}, {pipeline_mode = #tpu.pipeline_mode<synchronous>, transform_indices = @transform_1, window_bounds = array<i64: 16, 32>}, {pipeline_mode = #tpu.pipeline_mode<synchronous>, transform_indices = @transform_2, window_bounds = array<i64: 1, 32>}, {pipeline_mode = #tpu.pipeline_mode<synchronous>, transform_indices = @transform_3, window_bounds = array<i64: 32, 32>}, {pipeline_mode = #tpu.pipeline_mode<synchronous>, transform_indices = @transform_4, window_bounds = array<i64: 1, 32>}, {pipeline_mode = #tpu.pipeline_mode<synchronous>, transform_indices = @transform_5, window_bounds = array<i64: 32, 4>}, {pipeline_mode = #tpu.pipeline_mode<synchronous>, transform_indices = @transform_6, window_bounds = array<i64: 1, 4>}, {transform_indices = @transform_7, window_bounds = array<i64: 8, 4>}]} {
    %c0 = arith.constant 0 : index
    %c0_0 = arith.constant 0 : index
    %0 = vector.load %arg1[%c0, %c0_0] : memref<8x16xf32, #tpu.memory_space<vmem>>, vector<8x16xf32>
    %c0_1 = arith.constant 0 : index
    %c0_2 = arith.constant 0 : index
    %1 = vector.load %arg2[%c0_1, %c0_2] : memref<16x32xbf16, #tpu.memory_space<vmem>>, vector<16x32xbf16>
    %c0_3 = arith.constant 0 : index
    %c0_4 = arith.constant 0 : index
    %2 = vector.load %arg3[%c0_3, %c0_4] : memref<1x32xf32, #tpu.memory_space<vmem>>, vector<1x32xf32>
    %3 = arith.truncf %0 : vector<8x16xf32> to vector<8x16xbf16>
    %cst = arith.constant dense<0.000000e+00> : vector<8x32xf32>
    %4 = tpu.matmul %3, %1, %cst {dimension_numbers = #tpu.dot_dimension_numbers<[1], [0], [0], [1], [0, 0, 1, 1], [], []>} : vector<8x16xbf16>, vector<16x32xbf16>, vector<8x32xf32> -> vector<8x32xf32>
    %5 = vector.broadcast %2 : vector<1x32xf32> to vector<8x32xf32>
    %6 = arith.addf %4, %5 : vector<8x32xf32>
    %cst_5 = arith.constant 0.000000e+00 : f32
    %7 = vector.broadcast %cst_5 : f32 to vector<8x32xf32>
    %8 = arith.maximumf %6, %7 : vector<8x32xf32>
    %c0_6 = arith.constant 0 : index
    %c0_7 = arith.constant 0 : index
    %9 = vector.load %arg4[%c0_6, %c0_7] : memref<32x32xbf16, #tpu.memory_space<vmem>>, vector<32x32xbf16>
    %c0_8 = arith.constant 0 : index
    %c0_9 = arith.constant 0 : index
    %10 = vector.load %arg5[%c0_8, %c0_9] : memref<1x32xf32, #tpu.memory_space<vmem>>, vector<1x32xf32>
    %11 = arith.truncf %8 : vector<8x32xf32> to vector<8x32xbf16>
    %cst_10 = arith.constant dense<0.000000e+00> : vector<8x32xf32>
    %12 = tpu.matmul %11, %9, %cst_10 {dimension_numbers = #tpu.dot_dimension_numbers<[1], [0], [0], [1], [0, 0, 1, 1], [], []>} : vector<8x32xbf16>, vector<32x32xbf16>, vector<8x32xf32> -> vector<8x32xf32>
    %13 = vector.broadcast %10 : vector<1x32xf32> to vector<8x32xf32>
    %14 = arith.addf %12, %13 : vector<8x32xf32>
    %cst_11 = arith.constant 0.000000e+00 : f32
    %15 = vector.broadcast %cst_11 : f32 to vector<8x32xf32>
    %16 = arith.maximumf %14, %15 : vector<8x32xf32>
    %c0_12 = arith.constant 0 : index
    %c0_13 = arith.constant 0 : index
    %17 = vector.load %arg6[%c0_12, %c0_13] : memref<32x4xbf16, #tpu.memory_space<vmem>>, vector<32x4xbf16>
    %c0_14 = arith.constant 0 : index
    %c0_15 = arith.constant 0 : index
    %18 = vector.load %arg7[%c0_14, %c0_15] : memref<1x4xf32, #tpu.memory_space<vmem>>, vector<1x4xf32>
    %19 = arith.truncf %16 : vector<8x32xf32> to vector<8x32xbf16>
    %cst_16 = arith.constant dense<0.000000e+00> : vector<8x4xf32>
    %20 = tpu.matmul %19, %17, %cst_16 {dimension_numbers = #tpu.dot_dimension_numbers<[1], [0], [0], [1], [0, 0, 1, 1], [], []>} : vector<8x32xbf16>, vector<32x4xbf16>, vector<8x4xf32> -> vector<8x4xf32>
    %21 = vector.broadcast %18 : vector<1x4xf32> to vector<8x4xf32>
    %22 = arith.addf %20, %21 : vector<8x4xf32>
    %cst_17 = arith.constant dense<0xFF800000> : vector<8xf32>
    %23 = vector.multi_reduction <maximumf>, %22, %cst_17 [1] : vector<8x4xf32> to vector<8xf32>
    %24 = vector.shape_cast %23 : vector<8xf32> to vector<8x1xf32>
    %25 = vector.broadcast %24 : vector<8x1xf32> to vector<8x4xf32>
    %26 = arith.subf %22, %25 : vector<8x4xf32>
    %27 = math.exp %26 : vector<8x4xf32>
    %cst_18 = arith.constant dense<0.000000e+00> : vector<8xf32>
    %28 = vector.multi_reduction <add>, %27, %cst_18 [1] : vector<8x4xf32> to vector<8xf32>
    %29 = vector.shape_cast %28 : vector<8xf32> to vector<8x1xf32>
    %30 = vector.broadcast %29 : vector<8x1xf32> to vector<8x4xf32>
    %31 = arith.divf %27, %30 : vector<8x4xf32>
    %c0_19 = arith.constant 0 : index
    %c0_20 = arith.constant 0 : index
    %32 = vector.load %arg8[%c0_19, %c0_20] : memref<8x4xf32, #tpu.memory_space<vmem>>, vector<8x4xf32>
    tpu.vector_store %arg8[%c0_19, %c0_20], %31 {strides = array<i32>} : memref<8x4xf32, #tpu.memory_space<vmem>>, vector<8x4xf32>,
    return
  }
  func.func @transform_0(%arg0: i32) -> (i32, i32) {
    %c0_i32 = arith.constant 0 : i32
    %c0_i32_0 = arith.constant 0 : i32
    return %arg0, %c0_i32 : i32, i32
  }
  func.func @transform_1(%arg0: i32) -> (i32, i32) {
    %c0_i32 = arith.constant 0 : i32
    %c0_i32_0 = arith.constant 0 : i32
    %c0_i32_1 = arith.constant 0 : i32
    return %c0_i32, %c0_i32_0 : i32, i32
  }
  func.func @transform_2(%arg0: i32) -> (i32, i32) {
    %c0_i32 = arith.constant 0 : i32
    %c0_i32_0 = arith.constant 0 : i32
    %c0_i32_1 = arith.constant 0 : i32
    return %c0_i32, %c0_i32_0 : i32, i32
  }
  func.func @transform_3(%arg0: i32) -> (i32, i32) {
    %c0_i32 = arith.constant 0 : i32
    %c0_i32_0 = arith.constant 0 : i32
    %c0_i32_1 = arith.constant 0 : i32
    return %c0_i32, %c0_i32_0 : i32, i32
  }
  func.func @transform_4(%arg0: i32) -> (i32, i32) {
    %c0_i32 = arith.constant 0 : i32
    %c0_i32_0 = arith.constant 0 : i32
    %c0_i32_1 = arith.constant 0 : i32
    return %c0_i32, %c0_i32_0 : i32, i32
  }
  func.func @transform_5(%arg0: i32) -> (i32, i32) {
    %c0_i32 = arith.constant 0 : i32
    %c0_i32_0 = arith.constant 0 : i32
    %c0_i32_1 = arith.constant 0 : i32
    return %c0_i32, %c0_i32_0 : i32, i32
  }
  func.func @transform_6(%arg0: i32) -> (i32, i32) {
    %c0_i32 = arith.constant 0 : i32
    %c0_i32_0 = arith.constant 0 : i32
    %c0_i32_1 = arith.constant 0 : i32
    return %c0_i32, %c0_i32_0 : i32, i32
  }
  func.func @transform_7(%arg0: i32) -> (i32, i32) {
    %c0_i32 = arith.constant 0 : i32
    %c0_i32_0 = arith.constant 0 : i32
    return %arg0, %c0_i32 : i32, i32
  }
}

</mosaic_0001>

<bundles_post_ra>
// kernel: tpu_custom_call.1
= control target key start
LH: loop header
LB: loop body
LE: loop exit
PB: predicated region body
PF: predicated region fallthrough
CT: control target
= control target key end

     0   :  { %12 = vsyncpa [#allocation3], 0  ;;  %s336_s24 = smov [#allocation2]   ;;  %s423_s0 = inlined_call_operand.vmem [shape: f32[8,16], index: 0, kind: input, shape index: {}]   ;;  %s424_s1 = inlined_call_operand.hbm [shape: bf16[16,32], index: 1, kind: input, shape index: {}]   ;;  %s425_s2 = inlined_call_operand.vmem [shape: f32[1,32], index: 2, kind: input, shape index: {}]   ;;  %s426_s3 = inlined_call_operand.vmem [shape: bf16[32,32], index: 3, kind: input, shape index: {}]   ;;  %s427_s4 = inlined_call_operand.vmem [shape: f32[1,32], index: 4, kind: input, shape index: {}]   ;;  %s428_s5 = inlined_call_operand.vmem [shape: bf16[32,4], index: 5, kind: input, shape index: {}]   ;;  %s429_s6 = inlined_call_operand.vmem [shape: f32[1,4], index: 6, kind: input, shape index: {}]   ;;  %s430_s7 = inlined_call_operand.vmem [shape: f32[8,4], index: 7, kind: output, shape index: {}]  }
   0x1   :  { %s20_s25 = sshll.u32 %s336_s24, 4  ;;  %s312_s28 = scalar_lea.hbm %s424_s1, 128  ;;  %s21_s25 = int_to_ptr.vmem [resolvable:$true] %s20_s25 }
   0x2   :  { %p313_p0 = scmp.ne.s32.totalorder %s424_s1, %s312_s28  ;;  %p316_p1 = scmp.lt.u32.totalorder %s312_s28, %s424_s1 }
   0x4   :  { %p318_p2 = pnand %p316_p1, %p313_p0 }
   0x6   :  { %321 = shalt.err (!%p318_p2)
}
   0x7   :  { %s322_s10 = scalar_lea.vmem %s21_s25, 128  ;;  %p327_p4 = scmp.lt.s32.totalorder %s21_s25, %s21_s25 }
   0x8   :  { %p323_p3 = scmp.ne.s32.totalorder %s21_s25, %s322_s10  ;;  %p328_p5 = scmp.lt.s32.totalorder %s322_s10, %s322_s10 }
   0xa   :  { %p329_p6 = por %p328_p5, %p327_p4 }
   0xc   :  { %p330_p7 = pnand %p329_p6, %p323_p3 }
   0xe   :  { %333 = shalt.err (!%p330_p7)
}
   0xf   :  { %s337_s11 = smov 64   ;;  %s338_s12 = smov 4  }
  0x10   :  { %26 = dma.hbm_to_vmem [thread:$0]  %s424_s1, 128, %s21_s25, [#allocation3], %s337_s11, %s337_s11, %s338_s12  }
  0x11   :  { %334 = dma.done.wait [#allocation3], 128  }
  0x12   :  { %335 = vsyncadd [#allocation3], 4294967168  ;;  %v339_v0 = vmov 0.0   ;;  %vm340_vm0 = vmmov 0   ;;  %v303_v1 = vld [vmem:[#allocation2] sm:$0xff]   ;;  %vm58_vm1 = vcmask 130048  }
  0x13   :  { %276 = vmatprep.subr.bf16.mxu0 %v339_v0  ;;  %278 = vmatprep.mubr.msk.bf16.mxu0 %vm340_vm0, %v339_v0  ;;  %v41_v2 = vld [vmem:[%s423_s0] sm:$0xff]  ;;  %v305_v5 = vld [vmem:[%s426_s3 + $0x8] sm:$0xff]   ;;  %vm127_vm2 = vcmask 261120   ;;  %vm239_vm3 = vcmask 31744  }
  0x14   :  { %282 = vmatprep.subr.bf16.mxu1 %v339_v0  ;;  %286 = vmatprep.mubr.msk.bf16.mxu1 %vm340_vm0, %v339_v0  ;;  %v45_v3 = vpack.c.bf16 %v41_v2, %v41_v2  ;;  %v304_v4 = vld [vmem:[%s426_s3] sm:$0xff]   ;;  %v307_v15 = vld [vmem:[%s428_s5 + $0x8] sm:$0xff]  }
  0x15   :  { %277 = vmatpush3.bf16.msra.mxu0 %v303_v1  ;;  %283 = vmatpush3.bf16.msra.mxu1 %v304_v4  ;;  %v306_v6 = vld [vmem:[%s428_s5] sm:$0xff]  }
  0x16   :  { %290 = vmatprep.subr.bf16.mxu0 %v339_v0  ;;  %284 = vmatprep.subr.bf16.mxu1 %v339_v0  ;;  %v257_v7 = vld [vmem:[%s425_s2] ss:$0 sm:$0xff] }
  0x17   :  { %v260_v16 = vld [vmem:[%s427_s4] ss:$0 sm:$0xff] }
  0x18   :  { %279 = vmatmul.mubr.msk.bf16.vlgmr.msra.gmra.mrb[0].mxu0 %vm58_vm1, %v45_v3  ;;  %v264_v24 = vld [vmem:[%s429_s6] ss:$0 sm:$0xff] }
  0x19   :  { %294 = vmatprep.mubr.msk.bf16.mxu0 %vm340_vm0, %v339_v0  ;;  %285 = vmatpush3.bf16.msra.mxu1 %v305_v5 }
  0x1a   :  { %291 = vmatpush3.bf16.msra.mxu0 %v306_v6 }
  0x1b   :  { %292 = vmatprep.subr.bf16.mxu0 %v339_v0 }
  0x1e   :  { %293 = vmatpush3.bf16.msra.mxu0 %v307_v15 }
  0xeb   :  { %v96_v8 = vpop.f32.mrb[0].mxu0 }
  0xec   :  { %v97_v9 = vadd.f32 %v257_v7, %v96_v8  ;;  %v280_v10 = vpop.f32.mrb[1].mxu0 }
  0xed   :  { %v99_v11 = vpop.f32.mrb[2].mxu0 }
  0xee   :  { %v102_v12 = vmax.f32 %v97_v9, 0.0  ;;  %v281_v13 = vpop.f32.mrb[3].mxu0 }
  0xf0   :  { %v108_v14 = vpack.c.bf16 %v102_v12, %v102_v12 }
  0xf2   :  { %287 = vmatmul.mubr.msk.bf16.vlgmr.msra.gmra.mrb[0].mxu1 %vm127_vm2, %v108_v14 }
 0x1c5   :  { %v165_v17 = vpop.f32.mrb[0].mxu1 }
 0x1c6   :  { %v166_v18 = vadd.f32 %v260_v16, %v165_v17  ;;  %v288_v19 = vpop.f32.mrb[1].mxu1 }
 0x1c7   :  { %v168_v20 = vpop.f32.mrb[2].mxu1 }
 0x1c8   :  { %v171_v21 = vmax.f32 %v166_v18, 0.0  ;;  %v289_v22 = vpop.f32.mrb[3].mxu1 }
 0x1ca   :  { %v177_v23 = vpack.c.bf16 %v171_v21, %v171_v21 }
 0x1cc   :  { %295 = vmatmul.mubr.msk.bf16.vlgmr.msra.gmra.mrb[4].mxu0 %vm127_vm2, %v177_v23 }
 0x29f   :  { %v233_v25 = vpop.f32.mrb[4].mxu0 }
 0x2a0   :  { %v234_v26 = vadd.f32 %v264_v24, %v233_v25  ;;  %v296_v27 = vpop.f32.mrb[5].mxu0 }
 0x2a1   :  { %v236_v28 = vpop.f32.mrb[6].mxu0 }
 0x2a2   :  { %v297_v29 = vpop.f32.mrb[7].mxu0  ;;  %v240_v30 = vsel %vm239_vm3, %v234_v26, -inf }
 0x2a3   :  { %241 = vmax.xlane.f32.xlu0 %v240_v30 }
 0x330   :  { %v242_v31 = vpop.xlane.xlu0 %241 }
 0x331   :  { %v243_v32 = vsub.f32 %v234_v26, %v242_v31 }
 0x333   :  { %v244_v33 = vmul.f32 1.442695, %v243_v32 }
 0x335   :  { %308 = vpow2.f32 %v244_v33 }
 0x33f   :  { %v309_v34 = vpop.eup %308 }
 0x340   :  { %v246_v35 = vsel %vm239_vm3, %v309_v34, 0.0 }
 0x341   :  { %247 = vadd.xlane.f32.xlu0 %v246_v35 }
 0x3ce   :  { %v248_v36 = vpop.xlane.xlu0 %247 }
 0x3cf   :  { %310 = vrcp.f32 %v248_v36 }
 0x3d9   :  { %v311_v37 = vpop.eup %310 }
 0x3da   :  { %v250_v38 = vmul.f32 %v311_v37, %v309_v34 }
 0x3dc   :  { %251 = vst.msk [vmem:[%s430_s7] sm:$0xff] %vm239_vm3, %v250_v38 }
 0x3dd   :  { %256 = vsyncpa [#allocation3], 1 }

</bundles_post_ra>
